<compile_context>
chip_gen: v6e
topology: v6e:2x2x1
jax: 0.10.0
libtpu: 0.0.40
codegen_flags: <defaults>
</compile_context>

<pallas_src>
import functools

import jax
import jax.numpy as jnp
from jax.experimental import pallas as pl
from jax.experimental.pallas import tpu as pltpu

HIDDEN = 64        # logical hidden size from the PyTorch module
HIDDEN_PAD = 128   # lane-dense padded hidden size; col HIDDEN is the bias unit
OUT_PAD = 128      # lane-dense padded output width
NEG_PAD = -1e9     # pad-lane logit -> exp() underflows to exactly 0


def _round_up(n, m):
    return (n + m - 1) // m * m


def policy_kernel(x_ref, w1_ref, b1_ref, w2_ref, out_ref):
    # fc1 + ReLU: bf16 MXU matmul, f32 accumulation, elementwise in f32.
    x = x_ref[...].astype(jnp.bfloat16)
    h = jnp.dot(x, w1_ref[...], preferred_element_type=jnp.float32)
    h = jnp.maximum(h + b1_ref[...], 0.0)          # bias unit: ReLU(0 + 1) == 1

    # fc2 (b2 folded into w2 via the bias unit); pad lanes receive NEG_PAD.
    logits = jnp.dot(h.astype(jnp.bfloat16), w2_ref[...],
                     preferred_element_type=jnp.float32)

    # Numerically-stable softmax over the full 128-lane row; pad lanes are 0.
    m = jnp.max(logits, axis=-1, keepdims=True)
    e = jnp.exp(logits - m)
    denom = jnp.sum(e, axis=-1, keepdims=True)
    out_ref[...] = (e / denom).astype(out_ref.dtype)   # exact: rows sum to 1


@functools.partial(jax.jit, static_argnames=("output_dim", "block_batch"))
def policy_forward(x, w1p, b1p, w2p, *, output_dim, block_batch=2048):
    """x: (batch, input_dim) f32; w1p/w2p: bf16 padded (in,128)/(128,128); b1p: f32 (1,128)."""
    batch, input_dim = x.shape
    hidden_pad = w1p.shape[1]
    out_pad = w2p.shape[1]

    # Batch tile: big (amortize per-step overhead), always a multiple of 8.
    tb = min(block_batch, batch)
    tb = max(_round_up(tb, 8), 8)
    padded = _round_up(batch, tb)
    if padded != batch:
        x = jnp.pad(x, ((0, padded - batch), (0, 0)))   # zero rows: harmless, sliced off

    out = pl.pallas_call(
        policy_kernel,
        out_shape=jax.ShapeDtypeStruct((padded, out_pad), jnp.float32),
        grid=(padded // tb,),
        in_specs=[
            # x: one batch tile per grid step (software pipelined).
            pl.BlockSpec((tb, input_dim), lambda i: (i, 0)),
            # weights / bias: constant index_map -> DMA'd once, VMEM-resident.
            pl.BlockSpec((input_dim, hidden_pad), lambda i: (0, 0)),
            pl.BlockSpec((1, hidden_pad), lambda i: (0, 0)),
            pl.BlockSpec((hidden_pad, out_pad), lambda i: (0, 0)),
        ],
        # Lane-dense (tb, 128) output block -> unmasked vector stores.
        out_specs=pl.BlockSpec((tb, out_pad), lambda i: (i, 0)),
        compiler_params=pltpu.CompilerParams(
            dimension_semantics=("parallel",),
        ),
    )(x, w1p, b1p, w2p)
    return out[:batch, :output_dim]


def init_params(key, input_dim, output_dim):
    """nn.Linear-style U(-1/sqrt(fan_in), 1/sqrt(fan_in)) init, stored (in, out).

    Returns lane-dense padded kernel params (bf16 weights, f32 bias) plus the
    original unpadded f32 params for the semantic reference check.
    """
    k1, k2, k3, k4 = jax.random.split(key, 4)
    bound1 = 1.0 / jnp.sqrt(jnp.float32(input_dim))
    bound2 = 1.0 / jnp.sqrt(jnp.float32(HIDDEN))
    w1 = jax.random.uniform(k1, (input_dim, HIDDEN), jnp.float32, -bound1, bound1)
    b1 = jax.random.uniform(k2, (HIDDEN,), jnp.float32, -bound1, bound1)
    w2 = jax.random.uniform(k3, (HIDDEN, output_dim), jnp.float32, -bound2, bound2)
    b2 = jax.random.uniform(k4, (output_dim,), jnp.float32, -bound2, bound2)

    # Pad hidden dim to 128; column HIDDEN becomes the bias unit (ReLU(1)=1).
    w1p = jnp.zeros((input_dim, HIDDEN_PAD), jnp.float32).at[:, :HIDDEN].set(w1)
    b1p = jnp.zeros((1, HIDDEN_PAD), jnp.float32).at[0, :HIDDEN].set(b1)
    b1p = b1p.at[0, HIDDEN].set(1.0)

    # Pad output dim to 128; fold b2 into the bias-unit row; pad lanes -> -1e9.
    w2p = jnp.zeros((HIDDEN_PAD, OUT_PAD), jnp.float32)
    w2p = w2p.at[:HIDDEN, :output_dim].set(w2)
    w2p = w2p.at[HIDDEN, :output_dim].set(b2)
    w2p = w2p.at[HIDDEN, output_dim:].set(NEG_PAD)

    return (w1p.astype(jnp.bfloat16), b1p, w2p.astype(jnp.bfloat16),
            (w1, b1, w2, b2))


def reference_padded(x, w1p, b1p, w2p, output_dim):
    """Pure-JAX reference with the identical bf16-operand / f32-accumulate math."""
    h = jnp.dot(x.astype(jnp.bfloat16), w1p, preferred_element_type=jnp.float32)
    h = jnp.maximum(h + b1p, 0.0)
    logits = jnp.dot(h.astype(jnp.bfloat16), w2p, preferred_element_type=jnp.float32)
    return jax.nn.softmax(logits, axis=-1)[:, :output_dim]


def reference_f32(x, w1, b1, w2, b2):
    """Full-f32 math matching the original PyTorch module semantics."""
    h = jnp.maximum(x @ w1 + b1, 0.0)
    return jax.nn.softmax(h @ w2 + b2, axis=-1)


if __name__ == "__main__":
    key = jax.random.PRNGKey(0)
    k_params, k_x, k_x2 = jax.random.split(key, 3)

    input_dim, output_dim = 16, 8
    w1p, b1p, w2p, (w1, b1, w2, b2) = init_params(k_params, input_dim, output_dim)

    # --- small RL-style batch (single grid step) ---
    batch = 8
    x = jax.random.normal(k_x, (batch, input_dim), jnp.float32)
    out = policy_forward(x, w1p, b1p, w2p, output_dim=output_dim)
    jax.block_until_ready(out)

    assert out.shape == (batch, output_dim)
    assert jnp.allclose(out, reference_padded(x, w1p, b1p, w2p, output_dim),
                        atol=2e-3, rtol=2e-3)
    assert jnp.allclose(out, reference_f32(x, w1, b1, w2, b2), atol=3e-2)
    assert jnp.allclose(jnp.sum(out, axis=-1), jnp.ones((batch,)), atol=1e-5)

    # --- multi-tile + ragged-batch path (grid > 1) ---
    batch2 = 520
    x2 = jax.random.normal(k_x2, (batch2, input_dim), jnp.float32)
    out2 = policy_forward(x2, w1p, b1p, w2p, output_dim=output_dim, block_batch=256)
    jax.block_until_ready(out2)

    assert out2.shape == (batch2, output_dim)
    assert jnp.allclose(out2, reference_padded(x2, w1p, b1p, w2p, output_dim),
                        atol=2e-3, rtol=2e-3)
    assert jnp.allclose(jnp.sum(out2, axis=-1), jnp.ones((batch2,)), atol=1e-5)

    print("KERNEL_OK")
</pallas_src>

<mosaic_0001>
module attributes {stable_mosaic.version = 11 : i64} {
  func.func @policy_kernel(%arg0: i32, %arg1: memref<8x16xf32, #tpu.memory_space<vmem>>, %arg2: memref<16x128xbf16, #tpu.memory_space<vmem>>, %arg3: memref<1x128xf32, #tpu.memory_space<vmem>>, %arg4: memref<128x128xbf16, #tpu.memory_space<vmem>>, %arg5: memref<8x128xf32, #tpu.memory_space<vmem>>) attributes {dimension_semantics = [#tpu.dimension_semantics<parallel>], iteration_bounds = array<i64: 1>, scalar_prefetch = 0 : i64, scratch_operands = 0 : i64, tpu.core_type = #tpu.core_type<tc>, window_params = [{transform_indices = @transform_0, window_bounds = array<i64: 8, 16>}, {pipeline_mode = #tpu.pipeline_mode<synchronous>, transform_indices = @transform_1, window_bounds = array<i64: 16, 128>}, {pipeline_mode = #tpu.pipeline_mode<synchronous>, transform_indices = @transform_2, window_bounds = array<i64: 1, 128>}, {pipeline_mode = #tpu.pipeline_mode<synchronous>, transform_indices = @transform_3, window_bounds = array<i64: 128, 128>}, {transform_indices = @transform_4, window_bounds = array<i64: 8, 128>}]} {
    %c0 = arith.constant 0 : index
    %c0_0 = arith.constant 0 : index
    %0 = vector.load %arg1[%c0, %c0_0] : memref<8x16xf32, #tpu.memory_space<vmem>>, vector<8x16xf32>
    %1 = arith.truncf %0 : vector<8x16xf32> to vector<8x16xbf16>
    %c0_1 = arith.constant 0 : index
    %c0_2 = arith.constant 0 : index
    %2 = vector.load %arg2[%c0_1, %c0_2] : memref<16x128xbf16, #tpu.memory_space<vmem>>, vector<16x128xbf16>
    %cst = arith.constant dense<0.000000e+00> : vector<8x128xf32>
    %3 = tpu.matmul %1, %2, %cst {dimension_numbers = #tpu.dot_dimension_numbers<[1], [0], [0], [1], [0, 0, 1, 1], [], []>} : vector<8x16xbf16>, vector<16x128xbf16>, vector<8x128xf32> -> vector<8x128xf32>
    %c0_3 = arith.constant 0 : index
    %c0_4 = arith.constant 0 : index
    %4 = vector.load %arg3[%c0_3, %c0_4] : memref<1x128xf32, #tpu.memory_space<vmem>>, vector<1x128xf32>
    %5 = vector.broadcast %4 : vector<1x128xf32> to vector<8x128xf32>
    %6 = arith.addf %3, %5 : vector<8x128xf32>
    %cst_5 = arith.constant 0.000000e+00 : f32
    %7 = vector.broadcast %cst_5 : f32 to vector<8x128xf32>
    %8 = arith.maximumf %6, %7 : vector<8x128xf32>
    %9 = arith.truncf %8 : vector<8x128xf32> to vector<8x128xbf16>
    %c0_6 = arith.constant 0 : index
    %c0_7 = arith.constant 0 : index
    %10 = vector.load %arg4[%c0_6, %c0_7] : memref<128x128xbf16, #tpu.memory_space<vmem>>, vector<128x128xbf16>
    %cst_8 = arith.constant dense<0.000000e+00> : vector<8x128xf32>
    %11 = tpu.matmul %9, %10, %cst_8 {dimension_numbers = #tpu.dot_dimension_numbers<[1], [0], [0], [1], [0, 0, 1, 1], [], []>} : vector<8x128xbf16>, vector<128x128xbf16>, vector<8x128xf32> -> vector<8x128xf32>
    %cst_9 = arith.constant dense<0xFF800000> : vector<8xf32>
    %12 = vector.multi_reduction <maximumf>, %11, %cst_9 [1] : vector<8x128xf32> to vector<8xf32>
    %13 = vector.shape_cast %12 : vector<8xf32> to vector<8x1xf32>
    %14 = vector.broadcast %13 : vector<8x1xf32> to vector<8x128xf32>
    %15 = arith.subf %11, %14 : vector<8x128xf32>
    %16 = math.exp %15 : vector<8x128xf32>
    %cst_10 = arith.constant dense<0.000000e+00> : vector<8xf32>
    %17 = vector.multi_reduction <add>, %16, %cst_10 [1] : vector<8x128xf32> to vector<8xf32>
    %18 = vector.shape_cast %17 : vector<8xf32> to vector<8x1xf32>
    %19 = vector.broadcast %18 : vector<8x1xf32> to vector<8x128xf32>
    %20 = arith.divf %16, %19 : vector<8x128xf32>
    %c0_11 = arith.constant 0 : index
    %c0_12 = arith.constant 0 : index
    %21 = vector.load %arg5[%c0_11, %c0_12] : memref<8x128xf32, #tpu.memory_space<vmem>>, vector<8x128xf32>
    tpu.vector_store %arg5[%c0_11, %c0_12], %20 {strides = array<i32>} : memref<8x128xf32, #tpu.memory_space<vmem>>, vector<8x128xf32>,
    return
  }
  func.func @transform_0(%arg0: i32) -> (i32, i32) {
    %c0_i32 = arith.constant 0 : i32
    %c0_i32_0 = arith.constant 0 : i32
    return %arg0, %c0_i32 : i32, i32
  }
  func.func @transform_1(%arg0: i32) -> (i32, i32) {
    %c0_i32 = arith.constant 0 : i32
    %c0_i32_0 = arith.constant 0 : i32
    %c0_i32_1 = arith.constant 0 : i32
    return %c0_i32, %c0_i32_0 : i32, i32
  }
  func.func @transform_2(%arg0: i32) -> (i32, i32) {
    %c0_i32 = arith.constant 0 : i32
    %c0_i32_0 = arith.constant 0 : i32
    %c0_i32_1 = arith.constant 0 : i32
    return %c0_i32, %c0_i32_0 : i32, i32
  }
  func.func @transform_3(%arg0: i32) -> (i32, i32) {
    %c0_i32 = arith.constant 0 : i32
    %c0_i32_0 = arith.constant 0 : i32
    %c0_i32_1 = arith.constant 0 : i32
    return %c0_i32, %c0_i32_0 : i32, i32
  }
  func.func @transform_4(%arg0: i32) -> (i32, i32) {
    %c0_i32 = arith.constant 0 : i32
    %c0_i32_0 = arith.constant 0 : i32
    return %arg0, %c0_i32 : i32, i32
  }
}

</mosaic_0001>

<bundles_post_ra>
// kernel: policy_forward.1
= control target key start
LH: loop header
LB: loop body
LE: loop exit
PB: predicated region body
PF: predicated region fallthrough
CT: control target
= control target key end

     0   :  { %9 = vsyncpa [#allocation3], 0  ;;  %s454_s0 = inlined_call_operand.hbm [shape: f32[8,16], index: 0, kind: input, shape index: {}]   ;;  %s455_s1 = inlined_call_operand.hbm [shape: bf16[16,128], index: 1, kind: input, shape index: {}]   ;;  %s456_s2 = inlined_call_operand.vmem [shape: f32[1,128], index: 2, kind: input, shape index: {}]   ;;  %s457_s3 = inlined_call_operand.hbm [shape: bf16[128,128], index: 3, kind: input, shape index: {}]   ;;  %s458_s4 = inlined_call_operand.hbm [shape: f32[8,128], index: 4, kind: output, shape index: {}]  }
   0x1   :  { %10 = vsyncpa [#allocation6], 0 }
   0x2   :  { %11 = vsyncpa [#allocation4], 0  ;;  %s406_s15 = smov [#allocation5]  }
   0x3   :  { %s27_s16 = sshll.u32 %s406_s15, 4  ;;  %s28_s16 = int_to_ptr.vmem [resolvable:$true] %s27_s16 }
   0x4   :  { %s328_s17 = scalar_lea.vmem %s28_s16, 128  ;;  %p333_p1 = scmp.lt.s32.totalorder %s28_s16, %s28_s16 }
   0x5   :  { %p329_p0 = scmp.ne.s32.totalorder %s28_s16, %s328_s17  ;;  %p334_p2 = scmp.lt.s32.totalorder %s328_s17, %s328_s17 }
   0x7   :  { %p335_p3 = por %p334_p2, %p333_p1 }
   0x9   :  { %p336_p4 = pnand %p335_p3, %p329_p0 }
   0xb   :  { %339 = shalt.err (!%p336_p4)
}
   0xc   :  { %s407_s18 = smov 64   ;;  %s408_s19 = smov 4  }
   0xd   :  { %33 = dma.hbm_to_vmem [thread:$0]  %s455_s1, 128, %s28_s16, [#allocation6], %s407_s18, %s407_s18, %s408_s19  }
   0xe   :  { %s409_s22 = smov [#allocation2]   ;;  %s410_s24 = smov [#allocation7]  }
   0xf   :  { %s18_s23 = sshll.u32 %s409_s22, 4  ;;  %s41_s25 = sshll.u32 %s410_s24, 4  ;;  %s19_s23 = int_to_ptr.vmem [resolvable:$true] %s18_s23  ;;  %s42_s25 = int_to_ptr.vmem [resolvable:$true] %s41_s25 }
  0x10   :  { %s348_s26 = scalar_lea.vmem %s19_s23, 128  ;;  %p353_p6 = scmp.lt.s32.totalorder %s19_s23, %s19_s23 }
  0x11   :  { %p349_p5 = scmp.ne.s32.totalorder %s19_s23, %s348_s26  ;;  %p354_p7 = scmp.lt.s32.totalorder %s348_s26, %s348_s26 }
  0x13   :  { %p355_p8 = por %p354_p7, %p353_p6 }
  0x15   :  { %p356_p9 = pnand %p355_p8, %p349_p5 }
  0x17   :  { %359 = shalt.err (!%p356_p9)
}
  0x18   :  { %21 = dma.hbm_to_vmem [thread:$0]  %s454_s0, 128, %s19_s23, [#allocation3]  }
  0x19   :  { %s368_s29 = scalar_lea.vmem %s42_s25, 1024  ;;  %p373_p11 = scmp.lt.s32.totalorder %s42_s25, %s42_s25 }
  0x1a   :  { %p369_p10 = scmp.ne.s32.totalorder %s42_s25, %s368_s29  ;;  %p374_p12 = scmp.lt.s32.totalorder %s368_s29, %s368_s29 }
  0x1c   :  { %p375_p13 = por %p374_p12, %p373_p11 }
  0x1e   :  { %p376_p0 = pnand %p375_p13, %p369_p10 }
  0x20   :  { %379 = shalt.err (!%p376_p0)
}
  0x21   :  { %47 = dma.hbm_to_vmem [thread:$0]  %s457_s3, 1024, %s42_s25, [#allocation6], %s407_s18, %s407_s18, %s408_s19  }
  0x22   :  { %400 = dma.done.wait [#allocation3], 128  }
  0x23   :  { %401 = vsyncadd [#allocation3], 4294967168 }
  0x24   :  { %402 = dma.done.wait [#allocation6], 1152  }
  0x25   :  { %403 = vsyncadd [#allocation6], 4294966144  ;;  %v411_v0 = vmov 0.0   ;;  %vm412_vm0 = vmmov 0   ;;  %v307_v1 = vld [vmem:[#allocation5] sm:$0xff]   ;;  %v58_v2 = vld [vmem:[#allocation2] sm:$0xff] }
  0x26   :  { %273 = vmatprep.subr.bf16.mxu0 %v411_v0  ;;  %275 = vmatprep.mubr.msk.bf16.mxu0 %vm412_vm0, %v411_v0  ;;  %v59_v3 = vpack.c.bf16 %v58_v2, %v58_v2  ;;  %vm75_vm1 = vcmask 130048   ;;  %v308_v4 = vld [vmem:[#allocation7 + $0x38] sm:$0xff]   ;;  %v309_v5 = vld [vmem:[#allocation7 + $0x30] sm:$0xff]   ;;  %v310_v6 = vld [vmem:[#allocation7 + $0x28] sm:$0xff]  }
  0x27   :  { %279 = vmatprep.subr.bf16.mxu1 %v411_v0  ;;  %295 = vmatprep.mubr.msk.bf16.mxu1 %vm412_vm0, %v411_v0  ;;  %v311_v7 = vld [vmem:[#allocation7 + $0x20] sm:$0xff]   ;;  %v312_v8 = vld [vmem:[#allocation7 + $0x18] sm:$0xff]   ;;  %v313_v9 = vld [vmem:[#allocation7 + $0x10] sm:$0xff]  }
  0x28   :  { %274 = vmatpush3.bf16.msra.mxu0 %v307_v1  ;;  %280 = vmatpush3.bf16.msra.mxu1 %v308_v4  ;;  %v314_v10 = vld [vmem:[#allocation7 + $0x8] sm:$0xff]   ;;  %v315_v11 = vld [vmem:[#allocation7] sm:$0xff]   ;;  %v251_v12 = vld [vmem:[%s456_s2] ss:$0 sm:$0xff]  ;;  %s413_s2 = smov [#allocation8]  }
  0x29   :  { %281 = vmatprep.subr.bf16.mxu1 %v411_v0  ;;  %s241_s5 = sshll.u32 %s413_s2, 4  ;;  %s242_s5 = int_to_ptr.vmem [resolvable:$true] %s241_s5 }
  0x2a   :  { %s380_s6 = scalar_lea.vmem %s242_s5, 128  ;;  %p385_p2 = scmp.lt.s32.totalorder %s242_s5, %s242_s5 }
  0x2b   :  { %276 = vmatmul.mubr.msk.bf16.vlgmr.msra.gmra.mxu0 %vm75_vm1, %v59_v3  ;;  %p381_p1 = scmp.ne.s32.totalorder %s242_s5, %s380_s6  ;;  %p386_p3 = scmp.lt.s32.totalorder %s380_s6, %s380_s6 }
  0x2c   :  { %282 = vmatpush3.bf16.msra.mxu1 %v309_v5 }
  0x2d   :  { %283 = vmatprep.subr.bf16.mxu1 %v411_v0  ;;  %p387_p4 = por %p386_p3, %p385_p2 }
  0x2f   :  { %p388_p5 = pnand %p387_p4, %p381_p1 }
  0x30   :  { %284 = vmatpush3.bf16.msra.mxu1 %v310_v6 }
  0x31   :  { %285 = vmatprep.subr.bf16.mxu1 %v411_v0 }
  0x34   :  { %286 = vmatpush3.bf16.msra.mxu1 %v311_v7 }
  0x35   :  { %287 = vmatprep.subr.bf16.mxu1 %v411_v0 }
  0x38   :  { %288 = vmatpush3.bf16.msra.mxu1 %v312_v8 }
  0x39   :  { %289 = vmatprep.subr.bf16.mxu1 %v411_v0 }
  0x3c   :  { %290 = vmatpush3.bf16.msra.mxu1 %v313_v9 }
  0x3d   :  { %291 = vmatprep.subr.bf16.mxu1 %v411_v0 }
  0x40   :  { %292 = vmatpush3.bf16.msra.mxu1 %v314_v10 }
  0x41   :  { %293 = vmatprep.subr.bf16.mxu1 %v411_v0 }
  0x44   :  { %294 = vmatpush3.bf16.msra.mxu1 %v315_v11 }
  0xeb   :  { %v113_v13 = vpop.f32.mrf.mxu0 }
  0xec   :  { %v114_v14 = vadd.f32 %v251_v12, %v113_v13 }
  0xed   :  { %v277_v15 = vpop.f32.mrf.mxu0 }
  0xee   :  { %v119_v16 = vmax.f32 %v114_v14, 0.0 }
  0xef   :  { %v116_v17 = vpop.f32.mrf.mxu0 }
  0xf0   :  { %v120_v18 = vpack.c.bf16 %v119_v16, %v119_v16 }
  0xf1   :  { %v278_v19 = vpop.f32.mrf.mxu0 }
  0xf2   :  { %296 = vmatmul.mubr.bf16.vlgmr.msra.gmra.mxu1 %v120_v18 }
 0x1b2   :  { %v219_v20 = vpop.f32.mrf.mxu1 }
 0x1b3   :  { %225 = vmax.xlane.f32.xlu0 %v219_v20 }
 0x1b4   :  { %v297_v21 = vpop.f32.mrf.mxu1 }
 0x1b6   :  { %v222_v22 = vpop.f32.mrf.mxu1 }
 0x1b8   :  { %v298_v23 = vpop.f32.mrf.mxu1 }
 0x23c   :  { %v226_v24 = vpop.xlane.xlu0 %225 }
 0x23d   :  { %v227_v25 = vsub.f32 %v219_v20, %v226_v24 }
 0x23f   :  { %v228_v26 = vmul.f32 1.442695, %v227_v25 }
 0x241   :  { %316 = vpow2.f32 %v228_v26 }
 0x24e   :  { %v317_v27 = vpop.eup %316 }
 0x24f   :  { %230 = vadd.xlane.f32.xlu0 %v317_v27 }
 0x2d8   :  { %v231_v28 = vpop.xlane.xlu0 %230 }
 0x2d9   :  { %318 = vrcp.f32 %v231_v28 }
 0x2e6   :  { %v319_v29 = vpop.eup %318 }
 0x2e7   :  { %v233_v30 = vmul.f32 %v319_v29, %v317_v27 }
 0x2e9   :  { %234 = vst [vmem:[#allocation8] sm:$0xff] %v233_v30 }
 0x2ea   :  { %391 = shalt.err (!%p388_p5)
}
 0x2eb   :  { %244 = dma.vmem_to_hbm [thread:$0]  %s242_s5, 128, %s458_s4, [#allocation4]  }
 0x2ec   :  { %404 = dma.done.wait [#allocation4], 128  }
 0x2ed   :  { %405 = vsyncadd [#allocation4], 4294967168 }
 0x2ee   :  { %248 = vsyncpa [#allocation3], 1 }
 0x2ef   :  { %249 = vsyncpa [#allocation6], 1 }
 0x2f0   :  { %250 = vsyncpa [#allocation4], 1 }

</bundles_post_ra>
